<compile_context>
chip_gen: v7x
topology: tpu7x:2x2x1
jax: 0.10.0
libtpu: 0.0.40
codegen_flags: <defaults>
</compile_context>

<pallas_src>
import jax
import jax.numpy as jnp
from jax.experimental import pallas as pl
from jax.experimental.pallas import tpu as pltpu


_LANE = 128
_BLOCK_BYTES_BUDGET = 8 << 20          # per-step block target (v7x-safe)


# ----------------------------------------------------------------------------
# Kernel body: pure VMEM copy. The gather out[..., k, ...] = x[..., perm[k], ...]
# is realised entirely in the input BlockSpec index_map via scalar prefetch.
# ----------------------------------------------------------------------------
def _shuffle_copy_kernel(perm_ref, x_ref, o_ref):
    del perm_ref  # consumed by the index_map, not by the body
    o_ref[...] = x_ref[...]


def _channel_shuffle_core(x5, perm):
    """x5: [m, b, c, rows, lane]; perm: [m, c] int32 -> same shape as x5."""
    m, b, c, rows, lane = x5.shape
    itemsize = jnp.dtype(x5.dtype).itemsize

    # Row tiling: only split when the slab is big AND we can keep an
    # (8, 128)-aligned block (otherwise use the full rows extent).
    row_tile = rows
    if lane % _LANE == 0 and rows % 8 == 0:
        while (b * row_tile * lane * itemsize > _BLOCK_BYTES_BUDGET
               and row_tile % 16 == 0):
            row_tile //= 2
    n_rt = rows // row_tile

    block = (1, b, 1, row_tile, lane)
    block_bytes = b * row_tile * lane * itemsize
    # 2 in-buffers + 2 out-buffers (double buffering) + headroom, capped so a
    # block sized here still pipelines on v7x (64 MiB physical VMEM).
    vmem_limit = int(min(48 << 20, max(16 << 20, 4 * block_bytes + (4 << 20))))

    grid_spec = pltpu.PrefetchScalarGridSpec(
        num_scalar_prefetch=1,           # perm table -> SMEM, fed to index_maps
        grid=(m, c, n_rt),
        in_specs=[
            pl.BlockSpec(
                block,
                # gather: source channel comes from the prefetched perm table
                lambda mi, ci, ri, perm_ref: (mi, 0, perm_ref[mi, ci], ri, 0),
            ),
        ],
        out_specs=pl.BlockSpec(
            block,
            lambda mi, ci, ri, perm_ref: (mi, 0, ci, ri, 0),
        ),
    )

    return pl.pallas_call(
        _shuffle_copy_kernel,
        out_shape=jax.ShapeDtypeStruct(x5.shape, x5.dtype),
        grid_spec=grid_spec,
        compiler_params=pltpu.CompilerParams(
            # (mod, channel) axes are fully independent -> megacore-shardable
            # on v7x; reduction-free row axis left "arbitrary".
            dimension_semantics=("parallel", "parallel", "arbitrary"),
            vmem_limit_bytes=vmem_limit,
        ),
    )(perm, x5)


def _shuffle_lane_dense(x5, perm2):
    """Reshape to a lane-dense layout, run the kernel, reshape back."""
    m, b, c, i, s = x5.shape
    f = i * s
    if f % _LANE == 0:
        rows, lane = f // _LANE, _LANE
    else:
        # TODO(synk): pad i*s up to a multiple of 128 for lane-dense stores on
        # ragged shapes; this fallback is correct but keeps masked stores.
        rows, lane = i, s
    xr = x5.reshape(m, b, c, rows, lane)
    out = _channel_shuffle_core(xr, perm2)
    return out.reshape(m, b, c, i, s)


@jax.jit
def channel_shuffle_pallas(x, perm):
    """out[b, k] = x[b, perm[k]] for a single [b, c, i, s] tensor."""
    perm2 = jnp.asarray(perm, jnp.int32)[None, :]
    return _shuffle_lane_dense(x[None], perm2)[0]


@jax.jit
def _fused_forward(x_stack, key, p):
    """x_stack: [m, b, c, i, s] -> (shuffled stack, per-mod labels [m])."""
    m, _, c, _, _ = x_stack.shape
    k_bern, k_perm = jax.random.split(key)
    applies = jax.random.uniform(k_bern, (m,)) < p                    # [m] bool
    perm_keys = jax.random.split(k_perm, m)
    rand_perms = jax.vmap(lambda kk: jax.random.permutation(kk, c))(perm_keys)
    identity = jnp.arange(c, dtype=jnp.int32)[None, :]
    perm_table = jnp.where(applies[:, None],
                           rand_perms.astype(jnp.int32), identity)    # [m, c]
    out = _shuffle_lane_dense(x_stack, perm_table)
    return out, applies.astype(jnp.float32)


# ----------------------------------------------------------------------------
# Module-level wrapper reproducing ChannelShuffleAugmenter.forward semantics.
# ----------------------------------------------------------------------------
def channel_shuffle_augmenter_forward(org_loc_inputs, locations, modalities,
                                      p, key, labels=None):
    pairs = [(loc, mod) for loc in locations for mod in modalities]
    xs = [org_loc_inputs[loc][mod] for loc, mod in pairs]
    b = xs[0].shape[0]

    same = all(x.shape == xs[0].shape and x.dtype == xs[0].dtype for x in xs)
    if same:
        # One fused kernel launch for every (loc, mod) tensor.
        out_stack, mod_labels = _fused_forward(jnp.stack(xs, 0), key,
                                               jnp.float32(p))
        outs = [out_stack[k] for k in range(len(pairs))]
    else:
        # Heterogeneous shapes: one kernel per tensor, still fully traced.
        outs, lbls = [], []
        for k, x in enumerate(xs):
            kk = jax.random.fold_in(key, k)
            k_bern, k_perm = jax.random.split(kk)
            apply = jax.random.uniform(k_bern, ()) < p
            c = x.shape[1]
            perm = jnp.where(
                apply,
                jax.random.permutation(k_perm, c).astype(jnp.int32),
                jnp.arange(c, dtype=jnp.int32))
            outs.append(channel_shuffle_pallas(x, perm))
            lbls.append(apply.astype(jnp.float32))
        mod_labels = jnp.stack(lbls)

    aug_loc_inputs = {}
    for (loc, mod), y in zip(pairs, outs):
        aug_loc_inputs.setdefault(loc, {})[mod] = y
    aug_mod_labels = jnp.tile(mod_labels[None, :], (b, 1))   # [b, n_loc*n_mod]
    return aug_loc_inputs, aug_mod_labels, labels


# ----------------------------------------------------------------------------
# Self-test
# ----------------------------------------------------------------------------
if __name__ == "__main__":
    key = jax.random.PRNGKey(0)

    locations = ["loc0"]
    modalities = ["acc", "gyro"]
    b, c, i, s = 2, 4, 16, 16   # x: [b, c, i, s]
    p = 1.0                     # train_mode='predictive', learn_framework='MTSS'

    # deterministic synthetic inputs
    org_loc_inputs = {}
    kk = key
    for loc in locations:
        org_loc_inputs[loc] = {}
        for mod in modalities:
            kk, sub = jax.random.split(kk)
            org_loc_inputs[loc][mod] = jax.random.normal(
                sub, (b, c, i, s), dtype=jnp.float32)

    # --- direct kernel check against a pure-JAX gather reference ------------
    x0 = org_loc_inputs["loc0"]["acc"]
    perm = jax.random.permutation(jax.random.PRNGKey(42), c).astype(jnp.int32)
    y0 = jax.block_until_ready(channel_shuffle_pallas(x0, perm))
    assert jnp.allclose(y0, x0[:, perm])

    # --- full forward --------------------------------------------------------
    aug_inputs, aug_mod_labels, _ = channel_shuffle_augmenter_forward(
        org_loc_inputs, locations, modalities, p, jax.random.PRNGKey(0))

    for loc in locations:
        for mod in modalities:
            jax.block_until_ready(aug_inputs[loc][mod])
    jax.block_until_ready(aug_mod_labels)

    # sanity: outputs are a channel permutation of inputs (p=1 => always shuffled)
    for loc in locations:
        for mod in modalities:
            x = org_loc_inputs[loc][mod]
            y = aug_inputs[loc][mod]
            assert y.shape == x.shape and y.dtype == x.dtype
            x_sorted = jnp.sort(x.reshape(b, c, -1), axis=1)
            y_sorted = jnp.sort(y.reshape(b, c, -1), axis=1)
            assert jnp.allclose(x_sorted, y_sorted)

    assert aug_mod_labels.shape == (b, len(locations) * len(modalities))
    assert bool(jnp.all(aug_mod_labels == 1.0))

    print("KERNEL_OK")
</pallas_src>

<mosaic_0001>
module attributes {stable_mosaic.version = 11 : i64} {
  func.func @_shuffle_copy_kernel(%arg0: i32, %arg1: i32, %arg2: i32, %arg3: memref<1x4xi32, #tpu.memory_space<smem>>, %arg4: memref<1x2x1x2x128xf32, #tpu.memory_space<vmem>>, %arg5: memref<1x2x1x2x128xf32, #tpu.memory_space<vmem>>) attributes {dimension_semantics = [#tpu.dimension_semantics<parallel>, #tpu.dimension_semantics<parallel>, #tpu.dimension_semantics<arbitrary>], iteration_bounds = array<i64: 1, 4, 1>, scalar_prefetch = 1 : i64, scratch_operands = 0 : i64, tpu.core_type = #tpu.core_type<tc>, window_params = [{transform_indices = @transform_0, window_bounds = array<i64: 1, 2, 1, 2, 128>}, {transform_indices = @transform_1, window_bounds = array<i64: 1, 2, 1, 2, 128>}]} {
    %c0 = arith.constant 0 : index
    %c0_0 = arith.constant 0 : index
    %c0_1 = arith.constant 0 : index
    %c0_2 = arith.constant 0 : index
    %c0_3 = arith.constant 0 : index
    %0 = vector.load %arg4[%c0, %c0_0, %c0_1, %c0_2, %c0_3] : memref<1x2x1x2x128xf32, #tpu.memory_space<vmem>>, vector<1x2x1x2x128xf32>
    %c0_4 = arith.constant 0 : index
    %c0_5 = arith.constant 0 : index
    %c0_6 = arith.constant 0 : index
    %c0_7 = arith.constant 0 : index
    %c0_8 = arith.constant 0 : index
    %1 = vector.load %arg5[%c0_4, %c0_5, %c0_6, %c0_7, %c0_8] : memref<1x2x1x2x128xf32, #tpu.memory_space<vmem>>, vector<1x2x1x2x128xf32>
    tpu.vector_store %arg5[%c0_4, %c0_5, %c0_6, %c0_7, %c0_8], %0 {strides = array<i32>} : memref<1x2x1x2x128xf32, #tpu.memory_space<vmem>>, vector<1x2x1x2x128xf32>,
    return
  }
  func.func @transform_0(%arg0: i32, %arg1: i32, %arg2: i32, %arg3: memref<1x4xi32, #tpu.memory_space<smem>>) -> (i32, i32, i32, i32, i32) {
    %0 = arith.index_cast %arg0 : i32 to index
    %1 = arith.index_cast %arg1 : i32 to index
    %2 = memref.load %arg3[%0, %1] : memref<1x4xi32, #tpu.memory_space<smem>>
    %c0_i32 = arith.constant 0 : i32
    %c0_i32_0 = arith.constant 0 : i32
    %c0_i32_1 = arith.constant 0 : i32
    return %arg0, %c0_i32, %2, %arg2, %c0_i32_0 : i32, i32, i32, i32, i32
  }
  func.func @transform_1(%arg0: i32, %arg1: i32, %arg2: i32, %arg3: memref<1x4xi32, #tpu.memory_space<smem>>) -> (i32, i32, i32, i32, i32) {
    %c0_i32 = arith.constant 0 : i32
    %c0_i32_0 = arith.constant 0 : i32
    %c0_i32_1 = arith.constant 0 : i32
    return %arg0, %c0_i32, %arg1, %arg2, %c0_i32_0 : i32, i32, i32, i32, i32
  }
}

</mosaic_0001>

<bundles_post_ra>
// kernel: channel_shuffle_pallas.1
= control target key start
LH: loop header
LB: loop body
LE: loop exit
PB: predicated region body
PF: predicated region fallthrough
CT: control target
= control target key end

     0   :  { %s602_s0 = inlined_call_operand.vmem [shape: s32[1,4], index: 0, kind: input, shape index: {}]   ;;  %s603_s1 = inlined_call_operand.vmem [shape: f32[1,2,4,2,128], index: 1, kind: input, shape index: {}]   ;;  %s604_s2 = inlined_call_operand.vmem [shape: f32[1,2,4,2,128], index: 2, kind: output, shape index: {}]  }
   0x1   :  { %s7_s11 = sshll.u32 %s602_s0, 4  ;;  %s8_s11 = int_to_ptr.vmem [resolvable:$true] %s7_s11 }
   0x2   :  { %s415_s12 = scalar_lea.vmem %s8_s11, 16  ;;  %p420_p1 = scmp.lt.s32.totalorder %s8_s11, %s8_s11 }
   0x3   :  { %p416_p0 = scmp.ne.s32.totalorder %s8_s11, %s415_s12  ;;  %p421_p2 = scmp.lt.s32.totalorder %s415_s12, %s415_s12 }
   0x5   :  { %p422_p3 = por %p421_p2, %p420_p1 }
   0x7   :  { %p423_p4 = pnand %p422_p3, %p416_p0 }
   0x9   :  { %426 = shalt.err (!%p423_p4)  }
   0xa   :  { %s485_s13 = smov [#allocation3]  }
   0xb   :  { %10 = dma.vmem_to_smem %s8_s11, 16, %s485_s13, [#allocation2] }
   0xc   :  { %455 = dma.done.wait [#allocation2], 16 }
   0xd   :  { %456 = vsyncadd [#allocation2], 4294967280 }
   0xe   :  { %12 = sfence }
   0xf   :  { %s504_s14 = smov 0   ;;  %s506_s15 = smov 0  }
  0x10   :  { %s508_s16 = smov 0   ;;  %s510_s0 = smov 0  }
  0x11   :  { %s512_s17 = smov 0   ;;  %s514_s18 = smov 0  }
  0x12   :  { %s516_s19 = smov 0  }
  0x13 LB: > { %s33_s20 = sadd.s32 1, %s479_s18  ;;  %s41_s21 = sshra.s32 %s479_s18, 7  ;;  %s483_s19 = sphi %s516_s19, %s18_s19   ;;  %s479_s18 = sphi %s514_s18, %s611_s18   ;;  %s475_s17 = sphi %s512_s17, %s610_s17   ;;  %s471_s0 = sphi %s510_s0, %s609_s0   ;;  %s467_s16 = sphi %s508_s16, %s608_s16   ;;  %s463_s15 = sphi %s506_s15, %s607_s15   ;;  %s459_s14 = sphi %s504_s14, %s606_s14  }
  0x14   : > { %p35_p5 = scmp.ge.s32.totalorder %s33_s20, 4  ;;  %s344_s22 = sshll.u32 %s41_s21, 7 }
  0x15   : > { %s46_s23 = sand.u32 127, %s479_s18  ;;  %s342_s24 = sadd.s32 4294967295, %s483_s19  }
  0x16   : > { %s613_s20 = smov (%p35_p5, %s33_s20), 0  ;;  %s47_s25 = sadd.s32 %s344_s22, %s46_s23 }
  0x17   : > { %s48_s26 = sld [smem:[#allocation3 + %s47_s25]]  ;;  %s49_s27 = sshra.s32 %s613_s20, 7 }
  0x18   : > { %s345_s28 = sshll.u32 %s49_s27, 7  ;;  %s54_s29 = sand.u32 127, %s613_s20 }
  0x19   : > { %s55_s30 = sadd.s32 %s345_s28, %s54_s29  ;;  %p71_p6 = scmp.ne.s32.totalorder %s471_s0, %s467_s16 }
  0x1a   : > { %s56_s3 = sld [smem:[#allocation3 + %s55_s30]]  ;;  %p72_p7 = scmp.eq.s32.totalorder %s483_s19, 0 }
  0x1b   : > { %s88_s4 = ssub.s32 %s479_s18, %s613_s20  ;;  %s94_s5 = sadd.s32 1, %s463_s15 }
  0x1c   : > { %p73_p8 = por %p72_p7, %p71_p6  ;;  %p92_p9 = scmp.eq.s32.totalorder %s88_s4, 0 }
  0x1d   : > { %p104_p10 = scmp.ne.s32.totalorder %s463_s15, %s459_s14  ;;  %p105_p11 = scmp.eq.s32.totalorder %s342_s24, 3 }
  0x1e   : > { %s556_s6 = scalar_select %p92_p9, %s463_s15, %s94_s5  }
  0x1f   : > { %p558_p12 = por %p105_p11, %p104_p10  ;;  %s64_s9 = sadd.s32 1, %s471_s0 }
  0x20   : > { %s58_s8 = ssub.s32 %s48_s26, %s56_s3  ;;  %p347_p0 = scmp.ge.s32.totalorder %s483_s19, 4 }
  0x21   : > { %p62_p13 = scmp.eq.s32.totalorder %s58_s8, 0 }
  0x22   : > { %127 = sbr.rel (%p347_p0) target bundleno = 52 (0x34), region = 16 }
  0x23   : > { %s564_s10 = scalar_select %p62_p13, %s471_s0, %s64_s9  }
  0x29   : > { %130 = sbr.rel (!%p73_p8) target bundleno = 52 (0x34), region = 20  ;;  %s132_s11 = sand.u32 (%p73_p8), 1, %s471_s0  }
  0x2a   : > { %s142_s12 = sld [smem:[#allocation3 + %s47_s25]] (%p73_p8)  ;;  %s348_s13 = sshll.u32 (%p73_p8), %s132_s11, 2 }
  0x2b   : > { %s134_s26 = scalar_lea.vmem (%p73_p8), [#allocation4], %s348_s13 }
  0x30   : > { %s350_s21 = sshll.u32 %s142_s12, 1 }
  0x31   : > { %s147_s24 = scalar_lea.vmem %s603_s1, %s350_s21 }
  0x32   : > { %v163_v0 = vld [vmem:[%s147_s24] sm:$0x3]  ;;  %v165_v1 = vld [vmem:[%s147_s24 + $0x8] sm:$0x3] }
  0x33   : > { %164 = vst [vmem:[%s134_s26] sm:$0x3] %v163_v0  ;;  %166 = vst [vmem:[%s134_s26 + $0x2] sm:$0x3] %v165_v1 }
  0x34 PF: > { %p351_p1 = scmp.ge.s32.totalorder %s483_s19, 1  ;;  %p184_p2 = scmp.lt.s32.totalorder %s483_s19, 5 }
  0x36   : > { %p185_p3 = pnand %p351_p1, %p184_p2 }
  0x37   : > { %s191_s25 = sand.u32 (!%p185_p3), 1, %s467_s16   ;;  %s206_s27 = sand.u32 (!%p185_p3), 1, %s459_s14  }
  0x38   : > { %188 = sbr.rel (%p185_p3) target bundleno = 70 (0x46), region = 54  ;;  %s352_s28 = sshll.u32 (!%p185_p3), %s191_s25, 2 }
  0x39   : > { %s353_s29 = sshll.u32 (!%p185_p3), %s206_s27, 2  ;;  %s193_s30 = scalar_lea.vmem (!%p185_p3), [#allocation4], %s352_s28 }
  0x3a   : > { %v217_v2 = vld [vmem:[%s193_s30] sm:$0xf] (!%p185_p3)   ;;  %s208_s3 = scalar_lea.vmem (!%p185_p3), [#allocation5], %s353_s29 }
  0x3b   : > { %219 = vst [vmem:[%s208_s3] sm:$0xf] (!%p185_p3), %v217_v2  }
  0x3f   : > { %227 = sbr.rel (!%p558_p12) target bundleno = 70 (0x46), region = 62  ;;  %s355_s4 = sshll.u32 (%p558_p12), %s475_s17, 1 }
  0x40   : > { %s232_s9 = scalar_lea.vmem (%p558_p12), %s604_s2, %s355_s4 }
  0x42   : > { %v248_v3 = vld [vmem:[%s208_s3] sm:$0x3] (%p558_p12)  ;;  %v250_v4 = vld [vmem:[%s208_s3 + $0x2] sm:$0x3] (%p558_p12) }
  0x43   : > { %249 = vst [vmem:[%s232_s9] sm:$0x3] (%p558_p12), %v248_v3  ;;  %251 = vst [vmem:[%s232_s9 + $0x8] sm:$0x3] (%p558_p12), %v250_v4 }
  0x46 PF: > { %s18_s19 = sadd.s32 1, %s483_s19   ;;  %s606_s14 = smov %s463_s15 }
  0x47   : > { %p15_p4 = scmp.ge.s32.totalorder %s18_s19, 6   ;;  %s607_s15 = smov %s556_s6 }
  0x48   : > { %s608_s16 = smov %s471_s0  ;;  %s609_s0 = smov %s564_s10 }
  0x49   : > { %s610_s17 = smov %s479_s18  ;;  %s611_s18 = smov %s613_s20 }
  0x4a   :  { %17 = sbr.rel (!%p15_p4) target bundleno = 19 (0x13), region = 127 }

</bundles_post_ra>
